<compile_context>
chip_gen: v7x
topology: tpu7x:2x2x1
jax: 0.10.0
libtpu: 0.0.40
codegen_flags: <defaults>
</compile_context>

<pallas_src>
import functools

import jax
import jax.numpy as jnp
from jax.experimental import pallas as pl
from jax.experimental.pallas import tpu as pltpu


_EPS = 1e-5          # PyTorch BatchNorm1d default
_NEG_SLOPE = 0.01    # PyTorch LeakyReLU default
_LANE = 128
_SUBLANE = 8


def _round_up(n, m):
    return ((n + m - 1) // m) * m


# -----------------------------------------------------------------------------
# Kernel: one grid step == one independent InvGenerator instance.
# -----------------------------------------------------------------------------
def _inv_generator_kernel(x_ref, vec_ref, w_ref, o_ref, *, S, Sp, Cp):
    """Fused forward: 3 x (BatchNorm1d -> Linear [-> LeakyReLU]), BN folded.

    Training-mode BN (batch statistics, PyTorch default for a fresh module) is
    folded into the following Linear so each layer is a single MXU push.
    """
    x = x_ref[...]                                   # (B, S) f32

    # ---- unpack packed parameters (static slices on VMEM refs) ----
    g1 = vec_ref[0:1, 0:S]
    b1 = vec_ref[1:2, 0:S]
    c1 = vec_ref[2:3, 0:Cp]
    g2 = vec_ref[3:4, 0:Cp]
    b2 = vec_ref[4:5, 0:Cp]
    c2 = vec_ref[5:6, 0:Cp]
    g3 = vec_ref[6:7, 0:Cp]
    b3 = vec_ref[7:8, 0:Cp]
    c3 = vec_ref[8:9, 0:Cp]

    w1 = w_ref[0:S, :]                               # (S,  Cp)
    w2 = w_ref[Sp:Sp + Cp, :]                        # (Cp, Cp)
    w3 = w_ref[Sp + Cp:Sp + 2 * Cp, :]               # (Cp, Cp)

    def bn_linear(h, g, b, w, c):
        # Two independent cross-sublane reductions (overlap on the XLU)
        # instead of the serial mean -> subtract -> mean-of-squares chain.
        mu = jnp.mean(h, axis=0, keepdims=True)
        m2 = jnp.mean(h * h, axis=0, keepdims=True)
        var = m2 - mu * mu                           # biased variance (BN training)
        scale = jax.lax.rsqrt(var + _EPS) * g        # (1, F_in)
        shift = b - mu * scale                       # (1, F_in)
        # Shift folded into the activations: ONE MXU push per layer.
        return jnp.dot(h * scale + shift, w,
                       preferred_element_type=jnp.float32) + c

    def leaky(h):
        # mul + max instead of cmp + select + mul.
        return jnp.maximum(h, _NEG_SLOPE * h)

    h = leaky(bn_linear(x, g1, b1, w1, c1))          # (B, Cp)
    h = leaky(bn_linear(h, g2, b2, w2, c2))          # (B, Cp)
    o_ref[...] = bn_linear(h, g3, b3, w3, c3).astype(o_ref.dtype)


# -----------------------------------------------------------------------------
# One-time parameter packing (call at init, NOT per forward).
# -----------------------------------------------------------------------------
def pack_params(params):
    """Pack the 13 tiny parameter arrays into two lane-dense f32 slabs.

    Returns (vecs, wslab):
      vecs : (16, VW)          rows = g1,b1,c1,g2,b2,c2,g3,b3,c3 (zero padded)
      wslab: (Sp + 2*Cp, Cp)   rows = [w1 | w2 | w3]            (zero padded)
    Zero pads keep the padded output columns exactly zero.
    """
    S = params["w1"].shape[0]
    num_inv = params["w3"].shape[1]
    hid = 2 * num_inv
    Cp = _round_up(max(hid, num_inv, 1), _LANE)
    Sp = _round_up(S, _SUBLANE)
    VW = _round_up(max(S, Cp), _LANE)

    def pad_row(v, width):
        v = v.reshape(1, -1).astype(jnp.float32)
        return jnp.pad(v, ((0, 0), (0, width - v.shape[1])))

    rows = [
        pad_row(params["g1"], VW), pad_row(params["b1"], VW), pad_row(params["c1"], VW),
        pad_row(params["g2"], VW), pad_row(params["b2"], VW), pad_row(params["c2"], VW),
        pad_row(params["g3"], VW), pad_row(params["b3"], VW), pad_row(params["c3"], VW),
    ]
    vecs = jnp.concatenate(rows, axis=0)                               # (9, VW)
    vecs = jnp.pad(vecs, ((0, 2 * _SUBLANE - vecs.shape[0]), (0, 0)))  # (16, VW)

    def pad_w(w, rows_to, cols_to):
        r, c = w.shape
        return jnp.pad(w.astype(jnp.float32), ((0, rows_to - r), (0, cols_to - c)))

    # TODO(synk): on v5e (low HBM BW) storing wslab in bf16 would halve the DMA
    # bytes of this mostly-zero slab; kept f32 here to preserve exact numerics.
    wslab = jnp.concatenate([
        pad_w(params["w1"], Sp, Cp),                 # rows [0, Sp)
        pad_w(params["w2"], Cp, Cp),                 # rows [Sp, Sp+Cp)
        pad_w(params["w3"], Cp, Cp),                 # rows [Sp+Cp, Sp+2Cp)
    ], axis=0)
    return vecs, wslab


def _vmem_limit_bytes(B, S, VW, R, Cp):
    # Derive from the actual footprint (double-buffered operands + headroom),
    # instead of a blanket 32 MiB -- matters on v7x's 64 MiB VMEM.
    per_step = 4 * (B * S + 16 * VW + R * Cp + B * Cp)   # f32 bytes per grid step
    return int(min(max(4 * per_step + (2 << 20), 4 << 20), 64 << 20))


# -----------------------------------------------------------------------------
# Public forwards
# -----------------------------------------------------------------------------
@functools.partial(jax.jit, static_argnames=("num_inv", "return_padded"))
def inv_generator_forward_stacked(states, vecs, wslab, *, num_inv,
                                  return_padded=False):
    """N independent InvGenerator instances in one launch.

    states: (N, B, S); vecs: (N, 16, VW); wslab: (N, R, Cp)  -- all f32.
    Returns (N, B, num_inv), or (N, B, Cp) lane-padded if return_padded=True
    (padded columns are exactly zero; keeping them avoids the narrowing copy).
    """
    N, B, S = states.shape
    VW = vecs.shape[-1]
    R, Cp = wslab.shape[-2], wslab.shape[-1]
    Sp = R - 2 * Cp

    kernel = functools.partial(_inv_generator_kernel, S=S, Sp=Sp, Cp=Cp)
    out = pl.pallas_call(
        kernel,
        grid=(N,),                                   # one instance per grid step
        in_specs=[
            pl.BlockSpec((None, B, S), lambda n: (n, 0, 0)),
            pl.BlockSpec((None, 16, VW), lambda n: (n, 0, 0)),
            pl.BlockSpec((None, R, Cp), lambda n: (n, 0, 0)),
        ],
        out_specs=pl.BlockSpec((None, B, Cp), lambda n: (n, 0, 0)),
        out_shape=jax.ShapeDtypeStruct((N, B, Cp), jnp.float32),
        compiler_params=pltpu.CompilerParams(
            dimension_semantics=("parallel",),       # shard instances across TCs
            vmem_limit_bytes=_vmem_limit_bytes(B, S, VW, R, Cp),
        ),
    )(states, vecs, wslab)

    if return_padded:
        return out
    return out[..., :num_inv]


def inv_generator_forward(state, vecs, wslab, *, num_inv, return_padded=False):
    """Single-instance forward: state (B, S) -> (B, num_inv)."""
    out = inv_generator_forward_stacked(
        state[None], vecs[None], wslab[None],
        num_inv=num_inv, return_padded=return_padded)
    return out[0]


# -----------------------------------------------------------------------------
# Parameter init (PyTorch defaults) and pure-JAX reference
# -----------------------------------------------------------------------------
def init_params(key, state_size, num_inv):
    """Linear: U(-1/sqrt(fan_in), 1/sqrt(fan_in)); BatchNorm: gamma=1, beta=0.
    Weights stored transposed, i.e. shape [in, out]."""
    hid = 2 * num_inv
    k1, k2, k3, k4, k5, k6 = jax.random.split(key, 6)

    def lin(kw, kb, fan_in, fan_out):
        bound = 1.0 / jnp.sqrt(jnp.float32(fan_in))
        w = jax.random.uniform(kw, (fan_in, fan_out), jnp.float32, -bound, bound)
        b = jax.random.uniform(kb, (1, fan_out), jnp.float32, -bound, bound)
        return w, b

    w1, c1 = lin(k1, k2, state_size, hid)
    w2, c2 = lin(k3, k4, hid, hid)
    w3, c3 = lin(k5, k6, hid, num_inv)

    return {
        "g1": jnp.ones((1, state_size), jnp.float32),
        "b1": jnp.zeros((1, state_size), jnp.float32),
        "w1": w1, "c1": c1,
        "g2": jnp.ones((1, hid), jnp.float32),
        "b2": jnp.zeros((1, hid), jnp.float32),
        "w2": w2, "c2": c2,
        "g3": jnp.ones((1, hid), jnp.float32),
        "b3": jnp.zeros((1, hid), jnp.float32),
        "w3": w3, "c3": c3,
    }


def _reference_forward(state, params):
    """Pure-JAX reference (unfolded math) for correctness check."""
    def bn(h, g, b):
        mu = jnp.mean(h, axis=0, keepdims=True)
        var = jnp.mean((h - mu) ** 2, axis=0, keepdims=True)
        return (h - mu) * jax.lax.rsqrt(var + _EPS) * g + b

    def lrelu(h):
        return jnp.where(h > 0, h, _NEG_SLOPE * h)

    h = bn(state, params["g1"], params["b1"])
    h = lrelu(h @ params["w1"] + params["c1"])
    h = bn(h, params["g2"], params["b2"])
    h = lrelu(h @ params["w2"] + params["c2"])
    h = bn(h, params["g3"], params["b3"])
    return h @ params["w3"] + params["c3"]


if __name__ == "__main__":
    batch_size = 8
    state_size = 32
    num_inv = 8
    n_instances = 4

    root = jax.random.PRNGKey(0)
    k_states, k_params = jax.random.split(root)
    state_keys = jax.random.split(k_states, n_instances)
    param_keys = jax.random.split(k_params, n_instances)

    states = [jax.random.normal(k, (batch_size, state_size), jnp.float32)
              for k in state_keys]
    params_list = [init_params(k, state_size, num_inv) for k in param_keys]

    # Parameter packing hoisted out of the per-call path: done ONCE here.
    packed = [pack_params(p) for p in params_list]
    vecs_stacked = jnp.stack([v for v, _ in packed])     # (N, 16, 128)
    wslab_stacked = jnp.stack([w for _, w in packed])    # (N, 288, 128)
    states_stacked = jnp.stack(states)                   # (N, B, S)

    # --- single-instance path ---
    out0 = inv_generator_forward(states[0], packed[0][0], packed[0][1],
                                 num_inv=num_inv)
    out0 = jax.block_until_ready(out0)
    ref0 = _reference_forward(states[0], params_list[0])
    assert out0.shape == (batch_size, num_inv)
    assert jnp.allclose(out0, ref0, atol=1e-4, rtol=1e-4), "single mismatch"

    # --- stacked-instance path (grid=(N,), "parallel") ---
    outs = inv_generator_forward_stacked(
        states_stacked, vecs_stacked, wslab_stacked, num_inv=num_inv)
    outs = jax.block_until_ready(outs)
    assert outs.shape == (n_instances, batch_size, num_inv)
    for i in range(n_instances):
        ref_i = _reference_forward(states[i], params_list[i])
        assert jnp.allclose(outs[i], ref_i, atol=1e-4, rtol=1e-4), f"mismatch {i}"

    print("KERNEL_OK")
</pallas_src>

<mosaic_0001>
module attributes {stable_mosaic.version = 11 : i64} {
  func.func @_inv_generator_kernel(%arg0: i32, %arg1: memref<1x8x32xf32, #tpu.memory_space<vmem>>, %arg2: memref<1x16x128xf32, #tpu.memory_space<vmem>>, %arg3: memref<1x288x128xf32, #tpu.memory_space<vmem>>, %arg4: memref<1x8x128xf32, #tpu.memory_space<vmem>>) attributes {dimension_semantics = [#tpu.dimension_semantics<parallel>], iteration_bounds = array<i64: 1>, scalar_prefetch = 0 : i64, scratch_operands = 0 : i64, tpu.core_type = #tpu.core_type<tc>, window_params = [{transform_indices = @transform_0, window_bounds = array<i64: 1, 8, 32>}, {transform_indices = @transform_1, window_bounds = array<i64: 1, 16, 128>}, {transform_indices = @transform_2, window_bounds = array<i64: 1, 288, 128>}, {transform_indices = @transform_3, window_bounds = array<i64: 1, 8, 128>}]} {
    %c0 = arith.constant 0 : index
    %c0_0 = arith.constant 0 : index
    %c0_1 = arith.constant 0 : index
    %0 = vector.load %arg1[%c0, %c0_0, %c0_1] : memref<1x8x32xf32, #tpu.memory_space<vmem>>, vector<1x8x32xf32>
    %1 = vector.shape_cast %0 : vector<1x8x32xf32> to vector<8x32xf32>
    %c0_2 = arith.constant 0 : index
    %c0_3 = arith.constant 0 : index
    %c0_4 = arith.constant 0 : index
    %2 = vector.load %arg2[%c0_2, %c0_3, %c0_4] : memref<1x16x128xf32, #tpu.memory_space<vmem>>, vector<1x1x32xf32>
    %3 = vector.shape_cast %2 : vector<1x1x32xf32> to vector<1x32xf32>
    %c0_5 = arith.constant 0 : index
    %c1 = arith.constant 1 : index
    %c0_6 = arith.constant 0 : index
    %4 = vector.load %arg2[%c0_5, %c1, %c0_6] : memref<1x16x128xf32, #tpu.memory_space<vmem>>, vector<1x1x32xf32>
    %5 = vector.shape_cast %4 : vector<1x1x32xf32> to vector<1x32xf32>
    %c0_7 = arith.constant 0 : index
    %c2 = arith.constant 2 : index
    %c0_8 = arith.constant 0 : index
    %6 = vector.load %arg2[%c0_7, %c2, %c0_8] : memref<1x16x128xf32, #tpu.memory_space<vmem>>, vector<1x1x128xf32>
    %7 = vector.shape_cast %6 : vector<1x1x128xf32> to vector<1x128xf32>
    %c0_9 = arith.constant 0 : index
    %c3 = arith.constant 3 : index
    %c0_10 = arith.constant 0 : index
    %8 = vector.load %arg2[%c0_9, %c3, %c0_10] : memref<1x16x128xf32, #tpu.memory_space<vmem>>, vector<1x1x128xf32>
    %9 = vector.shape_cast %8 : vector<1x1x128xf32> to vector<1x128xf32>
    %c0_11 = arith.constant 0 : index
    %c4 = arith.constant 4 : index
    %c0_12 = arith.constant 0 : index
    %10 = vector.load %arg2[%c0_11, %c4, %c0_12] : memref<1x16x128xf32, #tpu.memory_space<vmem>>, vector<1x1x128xf32>
    %11 = vector.shape_cast %10 : vector<1x1x128xf32> to vector<1x128xf32>
    %c0_13 = arith.constant 0 : index
    %c5 = arith.constant 5 : index
    %c0_14 = arith.constant 0 : index
    %12 = vector.load %arg2[%c0_13, %c5, %c0_14] : memref<1x16x128xf32, #tpu.memory_space<vmem>>, vector<1x1x128xf32>
    %13 = vector.shape_cast %12 : vector<1x1x128xf32> to vector<1x128xf32>
    %c0_15 = arith.constant 0 : index
    %c6 = arith.constant 6 : index
    %c0_16 = arith.constant 0 : index
    %14 = vector.load %arg2[%c0_15, %c6, %c0_16] : memref<1x16x128xf32, #tpu.memory_space<vmem>>, vector<1x1x128xf32>
    %15 = vector.shape_cast %14 : vector<1x1x128xf32> to vector<1x128xf32>
    %c0_17 = arith.constant 0 : index
    %c7 = arith.constant 7 : index
    %c0_18 = arith.constant 0 : index
    %16 = vector.load %arg2[%c0_17, %c7, %c0_18] : memref<1x16x128xf32, #tpu.memory_space<vmem>>, vector<1x1x128xf32>
    %17 = vector.shape_cast %16 : vector<1x1x128xf32> to vector<1x128xf32>
    %c0_19 = arith.constant 0 : index
    %c8 = arith.constant 8 : index
    %c0_20 = arith.constant 0 : index
    %18 = vector.load %arg2[%c0_19, %c8, %c0_20] : memref<1x16x128xf32, #tpu.memory_space<vmem>>, vector<1x1x128xf32>
    %19 = vector.shape_cast %18 : vector<1x1x128xf32> to vector<1x128xf32>
    %c0_21 = arith.constant 0 : index
    %c0_22 = arith.constant 0 : index
    %c0_23 = arith.constant 0 : index
    %20 = vector.load %arg3[%c0_21, %c0_22, %c0_23] : memref<1x288x128xf32, #tpu.memory_space<vmem>>, vector<1x32x128xf32>
    %21 = vector.shape_cast %20 : vector<1x32x128xf32> to vector<32x128xf32>
    %c0_24 = arith.constant 0 : index
    %c32 = arith.constant 32 : index
    %c0_25 = arith.constant 0 : index
    %22 = vector.load %arg3[%c0_24, %c32, %c0_25] : memref<1x288x128xf32, #tpu.memory_space<vmem>>, vector<1x128x128xf32>
    %23 = vector.shape_cast %22 : vector<1x128x128xf32> to vector<128x128xf32>
    %c0_26 = arith.constant 0 : index
    %c160 = arith.constant 160 : index
    %c0_27 = arith.constant 0 : index
    %24 = vector.load %arg3[%c0_26, %c160, %c0_27] : memref<1x288x128xf32, #tpu.memory_space<vmem>>, vector<1x128x128xf32>
    %25 = vector.shape_cast %24 : vector<1x128x128xf32> to vector<128x128xf32>
    %cst = arith.constant dense<0.000000e+00> : vector<32xf32>
    %26 = vector.multi_reduction <add>, %1, %cst [0] : vector<8x32xf32> to vector<32xf32>
    %27 = vector.shape_cast %26 : vector<32xf32> to vector<1x32xf32>
    %cst_28 = arith.constant 8.000000e+00 : f32
    %28 = vector.broadcast %cst_28 : f32 to vector<1x32xf32>
    %29 = arith.divf %27, %28 : vector<1x32xf32>
    %30 = arith.mulf %1, %1 : vector<8x32xf32>
    %cst_29 = arith.constant dense<0.000000e+00> : vector<32xf32>
    %31 = vector.multi_reduction <add>, %30, %cst_29 [0] : vector<8x32xf32> to vector<32xf32>
    %32 = vector.shape_cast %31 : vector<32xf32> to vector<1x32xf32>
    %cst_30 = arith.constant 8.000000e+00 : f32
    %33 = vector.broadcast %cst_30 : f32 to vector<1x32xf32>
    %34 = arith.divf %32, %33 : vector<1x32xf32>
    %35 = arith.mulf %29, %29 : vector<1x32xf32>
    %36 = arith.subf %34, %35 : vector<1x32xf32>
    %cst_31 = arith.constant 9.99999974E-6 : f32
    %37 = vector.broadcast %cst_31 : f32 to vector<1x32xf32>
    %38 = arith.addf %36, %37 : vector<1x32xf32>
    %39 = math.rsqrt %38 : vector<1x32xf32>
    %40 = arith.mulf %39, %3 : vector<1x32xf32>
    %41 = arith.mulf %29, %40 : vector<1x32xf32>
    %42 = arith.subf %5, %41 : vector<1x32xf32>
    %43 = vector.broadcast %40 : vector<1x32xf32> to vector<8x32xf32>
    %44 = arith.mulf %1, %43 : vector<8x32xf32>
    %45 = vector.broadcast %42 : vector<1x32xf32> to vector<8x32xf32>
    %46 = arith.addf %44, %45 : vector<8x32xf32>
    %cst_32 = arith.constant dense<0.000000e+00> : vector<8x128xf32>
    %47 = tpu.matmul %46, %21, %cst_32 {dimension_numbers = #tpu.dot_dimension_numbers<[1], [0], [0], [1], [0, 0, 1, 1], [], []>} : vector<8x32xf32>, vector<32x128xf32>, vector<8x128xf32> -> vector<8x128xf32>
    %48 = vector.broadcast %7 : vector<1x128xf32> to vector<8x128xf32>
    %49 = arith.addf %47, %48 : vector<8x128xf32>
    %cst_33 = arith.constant 0.00999999977 : f32
    %50 = vector.broadcast %cst_33 : f32 to vector<8x128xf32>
    %51 = arith.mulf %50, %49 : vector<8x128xf32>
    %52 = arith.maximumf %49, %51 : vector<8x128xf32>
    %cst_34 = arith.constant dense<0.000000e+00> : vector<128xf32>
    %53 = vector.multi_reduction <add>, %52, %cst_34 [0] : vector<8x128xf32> to vector<128xf32>
    %54 = vector.shape_cast %53 : vector<128xf32> to vector<1x128xf32>
    %cst_35 = arith.constant 8.000000e+00 : f32
    %55 = vector.broadcast %cst_35 : f32 to vector<1x128xf32>
    %56 = arith.divf %54, %55 : vector<1x128xf32>
    %57 = arith.mulf %52, %52 : vector<8x128xf32>
    %cst_36 = arith.constant dense<0.000000e+00> : vector<128xf32>
    %58 = vector.multi_reduction <add>, %57, %cst_36 [0] : vector<8x128xf32> to vector<128xf32>
    %59 = vector.shape_cast %58 : vector<128xf32> to vector<1x128xf32>
    %cst_37 = arith.constant 8.000000e+00 : f32
    %60 = vector.broadcast %cst_37 : f32 to vector<1x128xf32>
    %61 = arith.divf %59, %60 : vector<1x128xf32>
    %62 = arith.mulf %56, %56 : vector<1x128xf32>
    %63 = arith.subf %61, %62 : vector<1x128xf32>
    %cst_38 = arith.constant 9.99999974E-6 : f32
    %64 = vector.broadcast %cst_38 : f32 to vector<1x128xf32>
    %65 = arith.addf %63, %64 : vector<1x128xf32>
    %66 = math.rsqrt %65 : vector<1x128xf32>
    %67 = arith.mulf %66, %9 : vector<1x128xf32>
    %68 = arith.mulf %56, %67 : vector<1x128xf32>
    %69 = arith.subf %11, %68 : vector<1x128xf32>
    %70 = vector.broadcast %67 : vector<1x128xf32> to vector<8x128xf32>
    %71 = arith.mulf %52, %70 : vector<8x128xf32>
    %72 = vector.broadcast %69 : vector<1x128xf32> to vector<8x128xf32>
    %73 = arith.addf %71, %72 : vector<8x128xf32>
    %cst_39 = arith.constant dense<0.000000e+00> : vector<8x128xf32>
    %74 = tpu.matmul %73, %23, %cst_39 {dimension_numbers = #tpu.dot_dimension_numbers<[1], [0], [0], [1], [0, 0, 1, 1], [], []>} : vector<8x128xf32>, vector<128x128xf32>, vector<8x128xf32> -> vector<8x128xf32>
    %75 = vector.broadcast %13 : vector<1x128xf32> to vector<8x128xf32>
    %76 = arith.addf %74, %75 : vector<8x128xf32>
    %cst_40 = arith.constant 0.00999999977 : f32
    %77 = vector.broadcast %cst_40 : f32 to vector<8x128xf32>
    %78 = arith.mulf %77, %76 : vector<8x128xf32>
    %79 = arith.maximumf %76, %78 : vector<8x128xf32>
    %cst_41 = arith.constant dense<0.000000e+00> : vector<128xf32>
    %80 = vector.multi_reduction <add>, %79, %cst_41 [0] : vector<8x128xf32> to vector<128xf32>
    %81 = vector.shape_cast %80 : vector<128xf32> to vector<1x128xf32>
    %cst_42 = arith.constant 8.000000e+00 : f32
    %82 = vector.broadcast %cst_42 : f32 to vector<1x128xf32>
    %83 = arith.divf %81, %82 : vector<1x128xf32>
    %84 = arith.mulf %79, %79 : vector<8x128xf32>
    %cst_43 = arith.constant dense<0.000000e+00> : vector<128xf32>
    %85 = vector.multi_reduction <add>, %84, %cst_43 [0] : vector<8x128xf32> to vector<128xf32>
    %86 = vector.shape_cast %85 : vector<128xf32> to vector<1x128xf32>
    %cst_44 = arith.constant 8.000000e+00 : f32
    %87 = vector.broadcast %cst_44 : f32 to vector<1x128xf32>
    %88 = arith.divf %86, %87 : vector<1x128xf32>
    %89 = arith.mulf %83, %83 : vector<1x128xf32>
    %90 = arith.subf %88, %89 : vector<1x128xf32>
    %cst_45 = arith.constant 9.99999974E-6 : f32
    %91 = vector.broadcast %cst_45 : f32 to vector<1x128xf32>
    %92 = arith.addf %90, %91 : vector<1x128xf32>
    %93 = math.rsqrt %92 : vector<1x128xf32>
    %94 = arith.mulf %93, %15 : vector<1x128xf32>
    %95 = arith.mulf %83, %94 : vector<1x128xf32>
    %96 = arith.subf %17, %95 : vector<1x128xf32>
    %97 = vector.broadcast %94 : vector<1x128xf32> to vector<8x128xf32>
    %98 = arith.mulf %79, %97 : vector<8x128xf32>
    %99 = vector.broadcast %96 : vector<1x128xf32> to vector<8x128xf32>
    %100 = arith.addf %98, %99 : vector<8x128xf32>
    %cst_46 = arith.constant dense<0.000000e+00> : vector<8x128xf32>
    %101 = tpu.matmul %100, %25, %cst_46 {dimension_numbers = #tpu.dot_dimension_numbers<[1], [0], [0], [1], [0, 0, 1, 1], [], []>} : vector<8x128xf32>, vector<128x128xf32>, vector<8x128xf32> -> vector<8x128xf32>
    %102 = vector.broadcast %19 : vector<1x128xf32> to vector<8x128xf32>
    %103 = arith.addf %101, %102 : vector<8x128xf32>
    %c0_47 = arith.constant 0 : index
    %c0_48 = arith.constant 0 : index
    %c0_49 = arith.constant 0 : index
    %104 = vector.load %arg4[%c0_47, %c0_48, %c0_49] : memref<1x8x128xf32, #tpu.memory_space<vmem>>, vector<1x8x128xf32>
    %105 = vector.shape_cast %104 : vector<1x8x128xf32> to vector<8x128xf32>
    %106 = vector.shape_cast %103 : vector<8x128xf32> to vector<1x8x128xf32>
    tpu.vector_store %arg4[%c0_47, %c0_48, %c0_49], %106 {strides = array<i32>} : memref<1x8x128xf32, #tpu.memory_space<vmem>>, vector<1x8x128xf32>,
    return
  }
  func.func @transform_0(%arg0: i32) -> (i32, i32, i32) {
    %c0_i32 = arith.constant 0 : i32
    %c0_i32_0 = arith.constant 0 : i32
    %c0_i32_1 = arith.constant 0 : i32
    return %arg0, %c0_i32, %c0_i32_0 : i32, i32, i32
  }
  func.func @transform_1(%arg0: i32) -> (i32, i32, i32) {
    %c0_i32 = arith.constant 0 : i32
    %c0_i32_0 = arith.constant 0 : i32
    %c0_i32_1 = arith.constant 0 : i32
    return %arg0, %c0_i32, %c0_i32_0 : i32, i32, i32
  }
  func.func @transform_2(%arg0: i32) -> (i32, i32, i32) {
    %c0_i32 = arith.constant 0 : i32
    %c0_i32_0 = arith.constant 0 : i32
    %c0_i32_1 = arith.constant 0 : i32
    return %arg0, %c0_i32, %c0_i32_0 : i32, i32, i32
  }
  func.func @transform_3(%arg0: i32) -> (i32, i32, i32) {
    %c0_i32 = arith.constant 0 : i32
    %c0_i32_0 = arith.constant 0 : i32
    %c0_i32_1 = arith.constant 0 : i32
    return %arg0, %c0_i32, %c0_i32_0 : i32, i32, i32
  }
}

</mosaic_0001>

<bundles_post_ra>
// kernel: inv_generator_forward_stacked.1
= control target key start
LH: loop header
LB: loop body
LE: loop exit
PB: predicated region body
PF: predicated region fallthrough
CT: control target
= control target key end

     0   :  { %8 = vsyncpa [#allocation3], 0  ;;  %s848_s0 = inlined_call_operand.hbm [shape: f32[1,8,32], index: 0, kind: input, shape index: {}]   ;;  %s849_s1 = inlined_call_operand.hbm [shape: f32[1,16,128], index: 1, kind: input, shape index: {}]   ;;  %s850_s2 = inlined_call_operand.hbm [shape: f32[1,288,128], index: 2, kind: input, shape index: {}]   ;;  %s851_s3 = inlined_call_operand.hbm [shape: f32[1,8,128], index: 3, kind: output, shape index: {}]  }
   0x1   :  { %9 = vsyncpa [#allocation6], 0 }
   0x2   :  { %10 = vsyncpa [#allocation4], 0  ;;  %s733_s12 = smov [#allocation5]   ;;  %s639_s16 = scalar_lea.hbm %s849_s1, 256 }
   0x3   :  { %s26_s13 = sshll.u32 %s733_s12, 4  ;;  %p640_p0 = scmp.ne.s32.totalorder %s849_s1, %s639_s16  ;;  %s27_s13 = int_to_ptr.vmem [resolvable:$true] %s26_s13 }
   0x4   :  { %p643_p1 = scmp.lt.u32.totalorder %s639_s16, %s849_s1 }
   0x6   :  { %p645_p2 = pnand %p643_p1, %p640_p0 }
   0x8   :  { %648 = shalt.err (!%p645_p2)
}
   0x9   :  { %s649_s21 = scalar_lea.vmem %s27_s13, 256  ;;  %p654_p4 = scmp.lt.s32.totalorder %s27_s13, %s27_s13 }
   0xa   :  { %p650_p3 = scmp.ne.s32.totalorder %s27_s13, %s649_s21  ;;  %p655_p5 = scmp.lt.s32.totalorder %s649_s21, %s649_s21 }
   0xc   :  { %p656_p6 = por %p655_p5, %p654_p4 }
   0xe   :  { %p657_p7 = pnand %p656_p6, %p650_p3 }
  0x10   :  { %660 = shalt.err (!%p657_p7)
}
  0x11   :  { %s734_s22 = smov 128   ;;  %s735_s23 = smov 8  }
  0x12   :  { %32 = dma.hbm_to_vmem [thread:$0]  %s849_s1, 256, %s27_s13, [#allocation6], %s734_s22, %s734_s22, %s735_s23  }
  0x13   :  { %s736_s26 = smov [#allocation2]   ;;  %s737_s28 = smov [#allocation7]  }
  0x14   :  { %s17_s27 = sshll.u32 %s736_s26, 4  ;;  %s38_s29 = sshll.u32 %s737_s28, 4  ;;  %s18_s27 = int_to_ptr.vmem [resolvable:$true] %s17_s27  ;;  %s39_s29 = int_to_ptr.vmem [resolvable:$true] %s38_s29 }
  0x15   :  { %s661_s5 = scalar_lea.hbm %s848_s0, 128 }
  0x16   :  { %p662_p8 = scmp.ne.s32.totalorder %s848_s0, %s661_s5  ;;  %p665_p9 = scmp.lt.u32.totalorder %s661_s5, %s848_s0 }
  0x18   :  { %p667_p10 = pnand %p665_p9, %p662_p8 }
  0x1a   :  { %670 = shalt.err (!%p667_p10)
}
  0x1b   :  { %s671_s1 = scalar_lea.vmem %s18_s27, 128  ;;  %p676_p12 = scmp.lt.s32.totalorder %s18_s27, %s18_s27 }
  0x1c   :  { %p672_p11 = scmp.ne.s32.totalorder %s18_s27, %s671_s1  ;;  %p677_p13 = scmp.lt.s32.totalorder %s671_s1, %s671_s1 }
  0x1e   :  { %p678_p0 = por %p677_p13, %p676_p12 }
  0x20   :  { %p679_p1 = pnand %p678_p0, %p672_p11 }
  0x22   :  { %682 = shalt.err (!%p679_p1)
}
  0x23   :  { %20 = dma.hbm_to_vmem [thread:$0]  %s848_s0, 128, %s18_s27, [#allocation3]  }
  0x24   :  { %s683_s14 = scalar_lea.hbm %s850_s2, 4608 }
  0x25   :  { %p684_p2 = scmp.ne.s32.totalorder %s850_s2, %s683_s14  ;;  %p687_p3 = scmp.lt.u32.totalorder %s683_s14, %s850_s2 }
  0x27   :  { %p689_p4 = pnand %p687_p3, %p684_p2 }
  0x29   :  { %692 = shalt.err (!%p689_p4)
}
  0x2a   :  { %s693_s19 = scalar_lea.vmem %s39_s29, 4608  ;;  %p698_p6 = scmp.lt.s32.totalorder %s39_s29, %s39_s29 }
  0x2b   :  { %p694_p5 = scmp.ne.s32.totalorder %s39_s29, %s693_s19  ;;  %p699_p7 = scmp.lt.s32.totalorder %s693_s19, %s693_s19 }
  0x2d   :  { %p700_p8 = por %p699_p7, %p698_p6 }
  0x2f   :  { %p701_p9 = pnand %p700_p8, %p694_p5 }
  0x31   :  { %704 = shalt.err (!%p701_p9)
}
  0x32   :  { %44 = dma.hbm_to_vmem [thread:$0]  %s850_s2, 4608, %s39_s29, [#allocation6], %s734_s22, %s734_s22, %s735_s23  }
  0x33   :  { %727 = dma.done.wait [#allocation3], 128  }
  0x34   :  { %728 = vsyncadd [#allocation3], 4294967168 }
  0x35   :  { %729 = dma.done.wait [#allocation6], 4864  }
  0x36   :  { %730 = vsyncadd [#allocation6], 4294962432  ;;  %v738_v0 = vmov 0.0|0.0   ;;  %vm739_vm0 = vmmov 0   ;;  %v740_v1 = vmov 0.0   ;;  %vm100_vm1 = vcmask 261120  }
  0x37   :  { %570 = vmatprep.subr.bf16.mxu0 %v738_v0  ;;  %497 = vmatprep.mubr.msk.f32.mxu0 %vm739_vm0, %v740_v1  ;;  %v64_v2 = vld [vmem:[#allocation7] sm:$0xff]  ;;  %v65_v3 = vld [vmem:[#allocation7 + $0x8] sm:$0xff]  ;;  %v66_v4 = vld [vmem:[#allocation7 + $0x10] sm:$0xff]  ;;  %v126_v29 = vlaneseq  ;;  %s741_s2 = smov [#allocation8]  }
  0x38   :  { %576 = vmatprep.subr.bf16.mxu1 %v738_v0  ;;  %532 = vmatprep.mubr.msk.f32.mxu1 %vm739_vm0, %v740_v1  ;;  %v571_v5 = vpack.c.bf16 %v65_v3, %v64_v2  ;;  %v67_v6 = vld [vmem:[#allocation7 + $0x18] sm:$0xff]  ;;  %v54_v7 = vld [vmem:[#allocation2] sm:$0xff]  ;;  %v55_v31 = vld [vmem:[#allocation5] sm:$0x1]  ;;  %s436_s21 = sshll.u32 %s741_s2, 4  ;;  %s437_s21 = int_to_ptr.vmem [resolvable:$true] %s436_s21 }
  0x39   :  { %v101_v8 = vsel %vm100_vm1, %v54_v7, 0.0  ;;  %v110_v9 = vmul.f32 %v54_v7, %v54_v7  ;;  %v574_v10 = vpack.c.bf16 %v67_v6, %v66_v4  ;;  %v127_v30 = vshrl.u32 %v126_v29, 7  ;;  %v56_v35 = vld [vmem:[#allocation5 + $0x1] sm:$0x1]  ;;  %v68_v42 = vld [vmem:[#allocation7 + $0x20] sm:$0xff]  ;;  %v69_v43 = vld [vmem:[#allocation7 + $0x28] sm:$0xff]  ;;  %p710_p11 = scmp.lt.s32.totalorder %s437_s21, %s437_s21 }
  0x3a   :  { %572 = vmatpush3.bf16.msra.mxu0 %v571_v5  ;;  %v102_v11 = vrot.slane %v101_v8, 4  ;;  %v577_v44 = vpack.c.bf16 %v69_v43, %v68_v42  ;;  %v70_v45 = vld [vmem:[#allocation7 + $0x30] sm:$0xff]  ;;  %v71_v46 = vld [vmem:[#allocation7 + $0x38] sm:$0xff]  ;;  %v72_v48 = vld [vmem:[#allocation7 + $0x40] sm:$0xff]  ;;  %s705_s22 = scalar_lea.vmem %s437_s21, 128 }
  0x3b   :  { %573 = vmatprep.subr.bf16.mxu0 %v738_v0  ;;  %v111_v12 = vsel %vm100_vm1, %v110_v9, 0.0  ;;  %v812_v32 = vsub.s32 0, %v127_v30  ;;  %v580_v47 = vpack.c.bf16 %v71_v46, %v70_v45  ;;  %v73_v49 = vld [vmem:[#allocation7 + $0x48] sm:$0xff]  ;;  %v74_v51 = vld [vmem:[#allocation7 + $0x50] sm:$0xff]  ;;  %v75_v52 = vld [vmem:[#allocation7 + $0x58] sm:$0xff]  ;;  %p706_p10 = scmp.ne.s32.totalorder %s437_s21, %s705_s22  ;;  %p711_p12 = scmp.lt.s32.totalorder %s705_s22, %s705_s22 }
  0x3c   :  { %v103_v13 = vadd.f32 %v102_v11, %v101_v8  ;;  %v112_v14 = vrot.slane %v111_v12, 4  ;;  %578 = vmatpush3.bf16.msra.mxu1 %v577_v44  ;;  %v583_v50 = vpack.c.bf16 %v73_v49, %v72_v48  ;;  %v586_v53 = vpack.c.bf16 %v75_v52, %v74_v51  ;;  %v76_v54 = vld [vmem:[#allocation7 + $0x60] sm:$0xff]  ;;  %v77_v55 = vld [vmem:[#allocation7 + $0x68] sm:$0xff]  ;;  %v78_v57 = vld [vmem:[#allocation7 + $0x70] sm:$0xff] }
  0x3d   :  { %579 = vmatprep.subr.bf16.mxu1 %v738_v0  ;;  %v589_v56 = vpack.c.bf16 %v77_v55, %v76_v54  ;;  %v79_v58 = vld [vmem:[#allocation7 + $0x78] sm:$0xff]  ;;  %v80_v60 = vld [vmem:[#allocation7 + $0x80] sm:$0xff]  ;;  %v81_v61 = vld [vmem:[#allocation7 + $0x88] sm:$0xff]  ;;  %p712_p13 = por %p711_p12, %p710_p11 }
  0x3e   :  { %575 = vmatpush3.bf16.msra.mxu0 %v574_v10  ;;  %v104_v15 = vrot.slane %v103_v13, 2  ;;  %v113_v16 = vadd.f32 %v112_v14, %v111_v12  ;;  %v592_v59 = vpack.c.bf16 %v79_v58, %v78_v57  ;;  %v595_v62 = vpack.c.bf16 %v81_v61, %v80_v60  ;;  %v82_v63 = vld [vmem:[#allocation7 + $0x90] sm:$0xff]  ;;  %v87_v42 = vld [vmem:[#allocation7 + $0xb8] sm:$0xff]  ;;  %v88_v44 = vld [vmem:[#allocation7 + $0xc0] sm:$0xff] }
  0x3f   :  { %600 = vmatprep.subr.bf16.mxu0 %v738_v0  ;;  %v446_v3 = vld [vmem:[#allocation5 + $0x2] ss:$0 sm:$0xff]  ;;  %v59_v30 = vld [vmem:[#allocation5 + $0x4] sm:$0x1]  ;;  %v89_v45 = vld [vmem:[#allocation7 + $0xc8] sm:$0xff]  ;;  %p713_p0 = pnand %p712_p13, %p706_p10 }
  0x40   :  { %v105_v17 = vadd.f32 %v104_v15, %v103_v13  ;;  %v114_v18 = vrot.slane %v113_v16, 2  ;;  %581 = vmatpush3.bf16.msra.mxu1 %v580_v47  ;;  %v607_v46 = vpack.c.bf16 %v89_v45, %v88_v44  ;;  %v90_v47 = vld [vmem:[#allocation7 + $0xd0] sm:$0xff]  ;;  %v91_v48 = vld [vmem:[#allocation7 + $0xd8] sm:$0xff]  ;;  %v93_v51 = vld [vmem:[#allocation7 + $0xe8] sm:$0xff] }
  0x41   :  { %582 = vmatprep.subr.bf16.mxu1 %v738_v0  ;;  %v610_v49 = vpack.c.bf16 %v91_v48, %v90_v47  ;;  %v95_v54 = vld [vmem:[#allocation7 + $0xf8] sm:$0xff]  ;;  %v97_v57 = vld [vmem:[#allocation7 + $0x108] sm:$0xff] }
  0x42   :  { %v106_v19 = vrot.slane %v105_v17, 1  ;;  %v115_v20 = vadd.f32 %v114_v18, %v113_v16  ;;  %v99_v60 = vld [vmem:[#allocation7 + $0x118] sm:$0xff] }
  0x44   :  { %v107_v21 = vadd.f32 %v106_v19, %v105_v17  ;;  %v116_v22 = vrot.slane %v115_v20, 1  ;;  %584 = vmatpush3.bf16.msra.mxu1 %v583_v50  ;;  %v92_v50 = vld [vmem:[#allocation7 + $0xe0] sm:$0xff] }
  0x45   :  { %585 = vmatprep.subr.bf16.mxu1 %v738_v0  ;;  %v613_v52 = vpack.c.bf16 %v93_v51, %v92_v50 }
  0x46   :  { %v109_v23 = vmul.f32 0.125, %v107_v21  ;;  %v117_v24 = vadd.f32 %v116_v22, %v115_v20 }
  0x48   :  { %v118_v25 = vmul.f32 0.125, %v117_v24  ;;  %v119_v26 = vmul.f32 %v109_v23, %v109_v23  ;;  %587 = vmatpush3.bf16.msra.mxu1 %v586_v53  ;;  %v94_v53 = vld [vmem:[#allocation7 + $0xf0] sm:$0xff] }
  0x49   :  { %588 = vmatprep.subr.bf16.mxu1 %v738_v0  ;;  %v616_v55 = vpack.c.bf16 %v95_v54, %v94_v53 }
  0x4a   :  { %v120_v27 = vsub.f32 %v118_v25, %v119_v26 }
  0x4c   :  { %v121_v28 = vadd.f32 1e-05, %v120_v27  ;;  %590 = vmatpush3.bf16.msra.mxu1 %v589_v56  ;;  %v58_v27 = vld [vmem:[#allocation5 + $0x3] sm:$0x1]  ;;  %v96_v56 = vld [vmem:[#allocation7 + $0x100] sm:$0xff] }
  0x4d   :  { %591 = vmatprep.subr.bf16.mxu1 %v738_v0  ;;  %v619_v58 = vpack.c.bf16 %v97_v57, %v96_v56 }
  0x4e   :  { %633 = vrsqrt.f32 %v121_v28 }
  0x50   :  { %593 = vmatpush3.bf16.msra.mxu1 %v592_v59  ;;  %v98_v59 = vld [vmem:[#allocation7 + $0x110] sm:$0xff] }
  0x51   :  { %594 = vmatprep.subr.bf16.mxu1 %v738_v0  ;;  %v622_v61 = vpack.c.bf16 %v99_v60, %v98_v59 }
  0x54   :  { %596 = vmatpush3.bf16.msra.mxu1 %v595_v62  ;;  %v448_v62 = vld [vmem:[#allocation5 + $0x5] ss:$0 sm:$0xff] }
  0x55   :  { %597 = vmatprep.subr.bf16.mxu1 %v738_v0 }
  0x58   :  { %v634_v33 = vpop.eup %633 }
  0x59   :  { %v123_v34 = vmul.f32 %v634_v33, %v55_v31 }
  0x5b   :  { %v124_v36 = vmul.f32 %v123_v34, %v109_v23  ;;  %v129_v37 = vrot.slane %v123_v34, %v812_v32 }
  0x5d   :  { %v125_v38 = vsub.f32 %v56_v35, %v124_v36  ;;  %v130_v39 = vmul.f32 %v129_v37, %v54_v7 }
  0x5f   :  { %v134_v40 = vrot.slane %v125_v38, %v812_v32  ;;  %v84_v38 = vld [vmem:[#allocation7 + $0xa0] sm:$0xff] }
  0x61   :  { %v135_v41 = vadd.f32 %v134_v40, %v130_v39  ;;  %v85_v39 = vld [vmem:[#allocation7 + $0xa8] sm:$0xff] }
  0x62   :  { %v601_v40 = vpack.c.bf16 %v85_v39, %v84_v38 }
  0x63   :  { %498 = vmatmul.mubr.msk.f32.vlgmr.msra.gmra.mrb[0].mxu0 %vm100_vm1, %v135_v41  ;;  %v86_v41 = vld [vmem:[#allocation7 + $0xb0] sm:$0xff] }
  0x64   :  { %567 = vmatprep.mubr.msk.f32.mxu0 %vm739_vm0, %v740_v1  ;;  %v83_v1 = vld [vmem:[#allocation7 + $0x98] sm:$0xff]  ;;  %602 = vmatpush3.bf16.msra.mxu0 %v601_v40  ;;  %v604_v43 = vpack.c.bf16 %v87_v42, %v86_v41 }
  0x65   :  { %v598_v2 = vpack.c.bf16 %v83_v1, %v82_v63  ;;  %603 = vmatprep.subr.bf16.mxu0 %v738_v0 }
  0x67   :  { %599 = vmatpush3.bf16.msra.mxu1 %v598_v2 }
  0x68   :  { %605 = vmatpush3.bf16.msra.mxu0 %v604_v43 }
  0x69   :  { %606 = vmatprep.subr.bf16.mxu0 %v738_v0 }
  0x6c   :  { %608 = vmatpush3.bf16.msra.mxu0 %v607_v46 }
  0x6d   :  { %609 = vmatprep.subr.bf16.mxu0 %v738_v0 }
  0x70   :  { %611 = vmatpush3.bf16.msra.mxu0 %v610_v49 }
  0x71   :  { %612 = vmatprep.subr.bf16.mxu0 %v738_v0 }
  0x74   :  { %614 = vmatpush3.bf16.msra.mxu0 %v613_v52 }
  0x75   :  { %615 = vmatprep.subr.bf16.mxu0 %v738_v0 }
  0x78   :  { %617 = vmatpush3.bf16.msra.mxu0 %v616_v55 }
  0x79   :  { %618 = vmatprep.subr.bf16.mxu0 %v738_v0 }
  0x7c   :  { %620 = vmatpush3.bf16.msra.mxu0 %v619_v58 }
  0x7d   :  { %621 = vmatprep.subr.bf16.mxu0 %v738_v0 }
  0x80   :  { %623 = vmatpush3.bf16.msra.mxu0 %v622_v61 }
 0x136   :  { %v209_v4 = vpop.f32.mrb[0].mxu0 }
 0x137   :  { %v210_v5 = vadd.f32 %v446_v3, %v209_v4  ;;  %v499_v6 = vpop.f32.mrb[1].mxu0 }
 0x139   :  { %v213_v7 = vmul.f32 0.01, %v210_v5 }
 0x13b   :  { %v214_v8 = vmax.f32 %v210_v5, %v213_v7 }
 0x13d   :  { %v215_v9 = vrot.slane %v214_v8, 4  ;;  %v222_v10 = vmul.f32 %v214_v8, %v214_v8 }
 0x13f   :  { %v216_v11 = vadd.f32 %v215_v9, %v214_v8  ;;  %v223_v12 = vrot.slane %v222_v10, 4 }
 0x141   :  { %v217_v13 = vrot.slane %v216_v11, 2  ;;  %v224_v14 = vadd.f32 %v223_v12, %v222_v10 }
 0x143   :  { %v218_v15 = vadd.f32 %v217_v13, %v216_v11  ;;  %v225_v16 = vrot.slane %v224_v14, 2 }
 0x145   :  { %v226_v17 = vadd.f32 %v225_v16, %v224_v14  ;;  %v219_v18 = vrot.slane %v218_v15, 1 }
 0x147   :  { %v227_v19 = vrot.slane %v226_v17, 1  ;;  %v220_v20 = vadd.f32 %v219_v18, %v218_v15 }
 0x149   :  { %v228_v21 = vadd.f32 %v227_v19, %v226_v17  ;;  %v221_v22 = vmul.f32 0.125, %v220_v20 }
 0x14b   :  { %v229_v23 = vmul.f32 0.125, %v228_v21  ;;  %v230_v24 = vmul.f32 %v221_v22, %v221_v22 }
 0x14d   :  { %v231_v25 = vsub.f32 %v229_v23, %v230_v24 }
 0x14f   :  { %v232_v26 = vadd.f32 1e-05, %v231_v25  ;;  %v62_v25 = vld [vmem:[#allocation5 + $0x7] sm:$0x1] }
 0x151   :  { %635 = vrsqrt.f32 %v232_v26 }
 0x15b   :  { %v636_v28 = vpop.eup %635 }
 0x15c   :  { %v234_v29 = vmul.f32 %v636_v28, %v58_v27 }
 0x15e   :  { %v235_v31 = vmul.f32 %v234_v29, %v221_v22  ;;  %v240_v33 = vrot.slane %v234_v29, %v812_v32  ;;  %v61_v22 = vld [vmem:[#allocation5 + $0x6] sm:$0x1] }
 0x160   :  { %v236_v34 = vsub.f32 %v59_v30, %v235_v31  ;;  %v241_v35 = vmul.f32 %v240_v33, %v214_v8  ;;  %v449_v33 = vld [vmem:[#allocation5 + $0x8] ss:$0 sm:$0xff] }
 0x162   :  { %v245_v36 = vrot.slane %v236_v34, %v812_v32 }
 0x164   :  { %v246_v37 = vadd.f32 %v245_v36, %v241_v35 }
 0x166   :  { %533 = vmatmul.mubr.f32.vlgmr.msra.gmra.mrb[0].mxu1 %v246_v37 }
 0x239   :  { %v317_v63 = vpop.f32.mrb[0].mxu1 }
 0x23a   :  { %v318_v1 = vadd.f32 %v448_v62, %v317_v63  ;;  %v534_v2 = vpop.f32.mrb[1].mxu1 }
 0x23c   :  { %v321_v3 = vmul.f32 0.01, %v318_v1 }
 0x23e   :  { %v322_v4 = vmax.f32 %v318_v1, %v321_v3 }
 0x240   :  { %v323_v5 = vrot.slane %v322_v4, 4  ;;  %v330_v6 = vmul.f32 %v322_v4, %v322_v4 }
 0x242   :  { %v324_v7 = vadd.f32 %v323_v5, %v322_v4  ;;  %v331_v8 = vrot.slane %v330_v6, 4 }
 0x244   :  { %v325_v9 = vrot.slane %v324_v7, 2  ;;  %v332_v10 = vadd.f32 %v331_v8, %v330_v6 }
 0x246   :  { %v326_v11 = vadd.f32 %v325_v9, %v324_v7  ;;  %v333_v12 = vrot.slane %v332_v10, 2 }
 0x248   :  { %v327_v13 = vrot.slane %v326_v11, 1  ;;  %v334_v14 = vadd.f32 %v333_v12, %v332_v10 }
 0x24a   :  { %v328_v15 = vadd.f32 %v327_v13, %v326_v11  ;;  %v335_v16 = vrot.slane %v334_v14, 1 }
 0x24c   :  { %v329_v0 = vmul.f32 0.125, %v328_v15  ;;  %v336_v17 = vadd.f32 %v335_v16, %v334_v14 }
 0x24e   :  { %v337_v18 = vmul.f32 0.125, %v336_v17  ;;  %v338_v19 = vmul.f32 %v329_v0, %v329_v0 }
 0x250   :  { %v339_v20 = vsub.f32 %v337_v18, %v338_v19 }
 0x252   :  { %v340_v21 = vadd.f32 1e-05, %v339_v20 }
 0x254   :  { %637 = vrsqrt.f32 %v340_v21 }
 0x25e   :  { %v638_v23 = vpop.eup %637 }
 0x25f   :  { %v342_v24 = vmul.f32 %v638_v23, %v61_v22 }
 0x261   :  { %v343_v26 = vmul.f32 %v342_v24, %v329_v0  ;;  %v348_v27 = vrot.slane %v342_v24, %v812_v32 }
 0x263   :  { %v344_v28 = vsub.f32 %v62_v25, %v343_v26  ;;  %v349_v29 = vmul.f32 %v348_v27, %v322_v4 }
 0x265   :  { %v353_v30 = vrot.slane %v344_v28, %v812_v32 }
 0x267   :  { %v354_v31 = vadd.f32 %v353_v30, %v349_v29 }
 0x269   :  { %568 = vmatmul.mubr.f32.vlgmr.msra.gmra.mrb[2].mxu0 %v354_v31 }
 0x33c   :  { %v425_v34 = vpop.f32.mrb[2].mxu0 }
 0x33d   :  { %v426_v35 = vadd.f32 %v449_v33, %v425_v34  ;;  %v569_v36 = vpop.f32.mrb[3].mxu0 }
 0x33f   :  { %429 = vst [vmem:[#allocation8] sm:$0xff] %v426_v35 }
 0x340   :  { %716 = shalt.err (!%p713_p0)
}
 0x341   :  { %s717_s25 = scalar_lea.hbm %s851_s3, 128 }
 0x342   :  { %p718_p1 = scmp.ne.s32.totalorder %s851_s3, %s717_s25  ;;  %p721_p2 = scmp.lt.u32.totalorder %s717_s25, %s851_s3 }
 0x344   :  { %p723_p3 = pnand %p721_p2, %p718_p1 }
 0x346   :  { %726 = shalt.err (!%p723_p3)
}
 0x347   :  { %439 = dma.vmem_to_hbm [thread:$0]  %s437_s21, 128, %s851_s3, [#allocation4]  }
 0x348   :  { %731 = dma.done.wait [#allocation4], 128  }
 0x349   :  { %732 = vsyncadd [#allocation4], 4294967168 }
 0x34a   :  { %443 = vsyncpa [#allocation3], 1 }
 0x34b   :  { %444 = vsyncpa [#allocation6], 1 }
 0x34c   :  { %445 = vsyncpa [#allocation4], 1 }

</bundles_post_ra>
